<compile_context>
chip_gen: v6e
topology: v6e:2x2x1
jax: 0.10.0
libtpu: 0.0.40
codegen_flags: <defaults>
</compile_context>

<pallas_src>
import functools

import jax
import jax.numpy as jnp
from jax import lax
from jax.experimental import pallas as pl
from jax.experimental.pallas import tpu as pltpu


VMEM_LIMIT_BYTES = 32 * 1024 * 1024        # safe on v5e/v6e/v7x
TILE_BUDGET_BYTES = VMEM_LIMIT_BYTES // 2  # headroom for compiler scratch


def _round_up(x, m):
    return ((x + m - 1) // m) * m


def _output_kernel(x_ref, w_ref, b_ref, o_ref):
    """One (batch-tile, K-tile) step of y = x @ W^T + b, W stored (N_pad, K)."""
    k = pl.program_id(1)

    @pl.when(k == 0)
    def _():
        # Initialize the (resident) output block with the broadcast bias, so
        # the reduction can accumulate straight into o_ref (no scratch, no
        # epilogue pass).
        o_ref[...] = jnp.broadcast_to(b_ref[...], o_ref.shape)

    # Contract over K (dim 1 of both operands) -> (tb, N_pad), f32 accumulate
    # on the MXU.  K is the dense (multiple-of-128) lane dim of both tiles.
    o_ref[...] += lax.dot_general(
        x_ref[...],
        w_ref[...],
        dimension_numbers=(((1,), (1,)), ((), ())),
        preferred_element_type=jnp.float32,
    )


def _pick_b_tile(B):
    """Batch tile: only split when the batch is large (gives a real parallel
    axis for v7x's two TensorCores); a batch sub-tile must be a sublane
    multiple (8) unless it equals the full batch."""
    if B <= 256:
        return B
    for tb in (512, 256, 128, 64, 32, 16, 8):
        if tb < B and B % tb == 0:
            return tb
    return B


def _pick_k_tile(tb, K_pad, N_pad, budget_bytes):
    """Largest K tile (multiple of 128, dividing K_pad) whose double-buffered
    bf16 x/W tiles plus the resident f32 output fit the VMEM budget."""
    resident = tb * N_pad * 4 + 2 * N_pad * 4  # f32 output + (double-buffered) bias

    def fits(tk):
        streamed = 2 * 2 * tk * (tb + N_pad)   # double-buffered bf16 x & W tiles
        return streamed + resident <= budget_bytes

    if fits(K_pad):
        return K_pad                            # single K step (no reduction loop)

    tk_max = (budget_bytes - resident) // (4 * (tb + N_pad))
    tk = max(128, (tk_max // 128) * 128)
    tk = min(tk, K_pad)
    while tk > 128 and K_pad % tk != 0:
        tk -= 128
    return tk                                   # 128 always divides K_pad


def prepare_output_params(weight, bias):
    """One-time parameter prep (hoisted out of the hot path):
    pad num_classes to the bf16 sublane multiple (16), pad input_size to a
    lane multiple (128), cast the weight to bf16.  Zero padding is exact for
    the matmul; padded output columns are sliced off in the wrapper."""
    N, K = weight.shape
    N_pad = _round_up(N, 16)
    K_pad = _round_up(K, 128)
    w_pad = jnp.zeros((N_pad, K_pad), dtype=jnp.bfloat16)
    w_pad = w_pad.at[:N, :K].set(weight.astype(jnp.bfloat16))
    b_pad = jnp.zeros((1, N_pad), dtype=jnp.float32)
    b_pad = b_pad.at[0, :N].set(bias.astype(jnp.float32))
    return w_pad, b_pad


@functools.partial(jax.jit, static_argnames=("num_classes",))
def output_forward(x, w_pad, b_pad, *, num_classes):
    """JAX/Pallas equivalent of Output.forward.

    x      : (B, C, H, W) float32 (any trailing dims; flattened like torch view)
    w_pad  : (N_pad, K_pad) bfloat16  from prepare_output_params
    b_pad  : (1, N_pad)     float32   from prepare_output_params
    returns: (B, num_classes) float32
    """
    B = x.shape[0]
    x_flat = x.reshape(B, -1)                 # == torch x.view(B, -1)
    K = x_flat.shape[1]
    N_pad, K_pad = w_pad.shape

    x_bf = x_flat.astype(jnp.bfloat16)
    if K_pad != K:                            # static shape decision
        x_bf = jnp.pad(x_bf, ((0, 0), (0, K_pad - K)))

    tb = _pick_b_tile(B)
    tk = _pick_k_tile(tb, K_pad, N_pad, TILE_BUDGET_BYTES)
    grid = (B // tb, K_pad // tk)

    out_padded = pl.pallas_call(
        _output_kernel,
        out_shape=jax.ShapeDtypeStruct((B, N_pad), jnp.float32),
        grid_spec=pltpu.PrefetchScalarGridSpec(
            num_scalar_prefetch=0,
            grid=grid,
            in_specs=[
                pl.BlockSpec((tb, tk), lambda b, k: (b, k)),       # x tile
                pl.BlockSpec((N_pad, tk), lambda b, k: (0, k)),    # W: K = lane dim
                pl.BlockSpec((1, N_pad), lambda b, k: (0, 0)),     # bias (resident)
            ],
            out_specs=pl.BlockSpec((tb, N_pad), lambda b, k: (b, 0)),
        ),
        compiler_params=pltpu.CompilerParams(
            dimension_semantics=("parallel", "arbitrary"),  # batch ∥, K reduction
            vmem_limit_bytes=VMEM_LIMIT_BYTES,
        ),
    )(x_bf, w_pad, b_pad)

    return out_padded[:, :num_classes]


if __name__ == "__main__":
    # Small shapes consistent with the module: NCHW input flattened to input_size.
    B, C, H, W = 2, 4, 16, 16
    input_size = C * H * W                    # 1024
    num_classes = 10

    key = jax.random.PRNGKey(0)
    kx, kw, kb = jax.random.split(key, 3)

    x = jax.random.normal(kx, (B, C, H, W), dtype=jnp.float32)
    weight = jax.random.normal(kw, (num_classes, input_size), dtype=jnp.float32) * 0.02
    bias = jax.random.normal(kb, (num_classes,), dtype=jnp.float32) * 0.01

    # One-time param prep (outside the hot path).
    w_pad, b_pad = prepare_output_params(weight, bias)
    w_pad, b_pad = jax.block_until_ready((w_pad, b_pad))

    y = output_forward(x, w_pad, b_pad, num_classes=num_classes)
    y = jax.block_until_ready(y)
    assert y.shape == (B, num_classes)

    # Reference computed with the same bf16 input/weight rounding (f32 math).
    x_bf = x.reshape(B, -1).astype(jnp.bfloat16).astype(jnp.float32)
    w_bf = weight.astype(jnp.bfloat16).astype(jnp.float32)
    y_ref = x_bf @ w_bf.T + bias
    assert jnp.allclose(y, y_ref, atol=1e-2, rtol=1e-2), "mismatch vs bf16 reference"

    # Looser sanity check against the full-f32 reference.
    y_ref_f32 = x.reshape(B, -1) @ weight.T + bias
    assert jnp.allclose(y, y_ref_f32, atol=5e-2, rtol=5e-2), "mismatch vs f32 reference"

    print("KERNEL_OK")
</pallas_src>

<mosaic_0001>
module attributes {stable_mosaic.version = 11 : i64} {
  func.func @_output_kernel(%arg0: i32, %arg1: i32, %arg2: memref<2x1024xbf16, #tpu.memory_space<vmem>>, %arg3: memref<16x1024xbf16, #tpu.memory_space<vmem>>, %arg4: memref<1x16xf32, #tpu.memory_space<vmem>>, %arg5: memref<2x16xf32, #tpu.memory_space<vmem>>) attributes {dimension_semantics = [#tpu.dimension_semantics<parallel>, #tpu.dimension_semantics<arbitrary>], iteration_bounds = array<i64: 1, 1>, scalar_prefetch = 0 : i64, scratch_operands = 0 : i64, tpu.core_type = #tpu.core_type<tc>, window_params = [{transform_indices = @transform_0, window_bounds = array<i64: 2, 1024>}, {transform_indices = @transform_1, window_bounds = array<i64: 16, 1024>}, {pipeline_mode = #tpu.pipeline_mode<synchronous>, transform_indices = @transform_2, window_bounds = array<i64: 1, 16>}, {transform_indices = @transform_3, window_bounds = array<i64: 2, 16>}]} {
    %c0_i32 = arith.constant 0 : i32
    %0 = arith.cmpi eq, %arg1, %c0_i32 : i32
    %1 = arith.extui %0 : i1 to i32
    %c0_i32_0 = arith.constant 0 : i32
    %2 = arith.cmpi ne, %1, %c0_i32_0 : i32
    scf.if %2 {
      %c0_8 = arith.constant 0 : index
      %c0_9 = arith.constant 0 : index
      %9 = vector.load %arg4[%c0_8, %c0_9] : memref<1x16xf32, #tpu.memory_space<vmem>>, vector<1x16xf32>
      %10 = vector.shape_cast %9 : vector<1x16xf32> to vector<1x16xf32>
      %11 = vector.broadcast %10 : vector<1x16xf32> to vector<2x16xf32>
      %c0_10 = arith.constant 0 : index
      %c0_11 = arith.constant 0 : index
      %12 = vector.load %arg5[%c0_10, %c0_11] : memref<2x16xf32, #tpu.memory_space<vmem>>, vector<2x16xf32>
      tpu.vector_store %arg5[%c0_10, %c0_11], %11 {strides = array<i32>} : memref<2x16xf32, #tpu.memory_space<vmem>>, vector<2x16xf32>,
    } else {
    }
    %c0 = arith.constant 0 : index
    %c0_1 = arith.constant 0 : index
    %3 = vector.load %arg5[%c0, %c0_1] : memref<2x16xf32, #tpu.memory_space<vmem>>, vector<2x16xf32>
    %c0_2 = arith.constant 0 : index
    %c0_3 = arith.constant 0 : index
    %4 = vector.load %arg2[%c0_2, %c0_3] : memref<2x1024xbf16, #tpu.memory_space<vmem>>, vector<2x1024xbf16>
    %c0_4 = arith.constant 0 : index
    %c0_5 = arith.constant 0 : index
    %5 = vector.load %arg3[%c0_4, %c0_5] : memref<16x1024xbf16, #tpu.memory_space<vmem>>, vector<16x1024xbf16>
    %cst = arith.constant dense<0.000000e+00> : vector<2x16xf32>
    %6 = tpu.matmul %4, %5, %cst {dimension_numbers = #tpu.dot_dimension_numbers<[1], [1], [0], [0], [0, 0, 1, 0], [], []>} : vector<2x1024xbf16>, vector<16x1024xbf16>, vector<2x16xf32> -> vector<2x16xf32>
    %7 = arith.addf %3, %6 : vector<2x16xf32>
    %c0_6 = arith.constant 0 : index
    %c0_7 = arith.constant 0 : index
    %8 = vector.load %arg5[%c0_6, %c0_7] : memref<2x16xf32, #tpu.memory_space<vmem>>, vector<2x16xf32>
    tpu.vector_store %arg5[%c0_6, %c0_7], %7 {strides = array<i32>} : memref<2x16xf32, #tpu.memory_space<vmem>>, vector<2x16xf32>,
    return
  }
  func.func @transform_0(%arg0: i32, %arg1: i32) -> (i32, i32) {
    %c0_i32 = arith.constant 0 : i32
    return %arg0, %arg1 : i32, i32
  }
  func.func @transform_1(%arg0: i32, %arg1: i32) -> (i32, i32) {
    %c0_i32 = arith.constant 0 : i32
    %c0_i32_0 = arith.constant 0 : i32
    return %c0_i32, %arg1 : i32, i32
  }
  func.func @transform_2(%arg0: i32, %arg1: i32) -> (i32, i32) {
    %c0_i32 = arith.constant 0 : i32
    %c0_i32_0 = arith.constant 0 : i32
    %c0_i32_1 = arith.constant 0 : i32
    return %c0_i32, %c0_i32_0 : i32, i32
  }
  func.func @transform_3(%arg0: i32, %arg1: i32) -> (i32, i32) {
    %c0_i32 = arith.constant 0 : i32
    %c0_i32_0 = arith.constant 0 : i32
    return %arg0, %c0_i32 : i32, i32
  }
}

</mosaic_0001>

<bundles_post_ra>
// kernel: output_forward.1
= control target key start
LH: loop header
LB: loop body
LE: loop exit
PB: predicated region body
PF: predicated region fallthrough
CT: control target
= control target key end

     0   :  { %v44_v3 = vlaneseq  ;;  %v348_v8 = vmov 1966171168   ;;  %s405_s0 = inlined_call_operand.vmem [shape: bf16[2,1024], index: 0, kind: input, shape index: {}]   ;;  %s406_s1 = inlined_call_operand.vmem [shape: bf16[16,1024], index: 1, kind: input, shape index: {}]   ;;  %s407_s2 = inlined_call_operand.vmem [shape: f32[1,16], index: 2, kind: input, shape index: {}]   ;;  %s408_s3 = inlined_call_operand.hbm [shape: f32[2,16], index: 3, kind: output, shape index: {}]  }
   0x1   :  { %v31_v0 = vld [vmem:[%s406_s1] sm:$0xff]  ;;  %v32_v2 = vld [vmem:[%s406_s1 + $0x8] sm:$0xff]  ;;  %v42_v9 = vunpack.c.l.s4 %v348_v8  ;;  %v33_v10 = vld [vmem:[%s406_s1 + $0x10] sm:$0xff] }
   0x2   :  { %v35_v1 = vld [vmem:[%s406_s1 + $0x20] sm:$0xff]  ;;  %v36_v6 = vld [vmem:[%s406_s1 + $0x28] sm:$0xff]  ;;  %v45_v13 = vshrl.u32 %v44_v3, 7  ;;  %v37_v14 = vld [vmem:[%s406_s1 + $0x30] sm:$0xff] }
   0x3   :  { %v316_v4 = vcombine.high %v31_v0, %v35_v1  ;;  %v315_v5 = vcombine.low %v31_v0, %v35_v1  ;;  %v30_v7 = vld [vmem:[%s405_s0] sm:$0xff]  ;;  %v318_v11 = vcombine.high %v32_v2, %v36_v6  ;;  %v317_v12 = vcombine.low %v32_v2, %v36_v6  ;;  %v34_v15 = vld [vmem:[%s406_s1 + $0x18] sm:$0xff] }
   0x4   :  { %v38_v16 = vld [vmem:[%s406_s1 + $0x38] sm:$0xff]  ;;  %v40_v17 = vcombine.high %v30_v7, %v30_v7  ;;  %v43_v18 = vunpack.c.0.s8 %v42_v9  ;;  %v320_v19 = vcombine.high %v33_v10, %v37_v14 }
   0x5   :  { %151 = vmatprep.subr.bf16.mxu0 %v316_v4 }
   0x6   :  { %8 = vsyncpa [#allocation3], 0  ;;  %152 = vmatpush1.bf16.xpose.msra.mxu0 %v315_v5  ;;  %191 = vmatprep.subr.bf16.mxu1 %v318_v11  ;;  %v322_v20 = vcombine.high %v34_v15, %v38_v16  ;;  %v46_v21 = vsub.s32 %v43_v18, %v45_v13  ;;  %v319_v28 = vcombine.low %v33_v10, %v37_v14  ;;  %v314_v36 = vld [vmem:[%s407_s2] ss:$0 sm:$0xff]  ;;  %vm27_vm0 = vcmask 123904   ;;  %s349_s30 = smov [#allocation2]  }
   0x7   :  { %192 = vmatpush1.bf16.xpose.msra.mxu1 %v317_v12  ;;  %231 = vmatprep.subr.bf16.mxu0 %v320_v19  ;;  %v321_v32 = vcombine.low %v34_v15, %v38_v16  ;;  %28 = vst.msk [vmem:[#allocation2] sm:$0x3] %vm27_vm0, %v314_v36  ;;  %s306_s4 = sshll.u32 %s349_s30, 4  ;;  %s307_s4 = int_to_ptr.vmem [resolvable:$true] %s306_s4 }
   0x8   :  { %271 = vmatprep.subr.bf16.mxu1 %v322_v20  ;;  %v47_v22 = vrot.slane %v30_v7, %v46_v21  ;;  %v54_v23 = vrot.slane %v40_v17, %v46_v21  ;;  %s326_s2 = scalar_lea.vmem %s307_s4, 32  ;;  %p331_p1 = scmp.lt.s32.totalorder %s307_s4, %s307_s4 }
   0x9   :  { %p327_p0 = scmp.ne.s32.totalorder %s307_s4, %s326_s2  ;;  %p332_p2 = scmp.lt.s32.totalorder %s326_s2, %s326_s2 }
   0xa   :  { %v55_v24 = vcombine.high %v47_v22, %v47_v22  ;;  %v63_v25 = vrot.slane %v47_v22, %v46_v21  ;;  %v56_v26 = vcombine.high %v54_v23, %v54_v23  ;;  %v70_v34 = vrot.slane %v54_v23, %v46_v21 }
   0xb   :  { %p333_p3 = por %p332_p2, %p331_p1 }
   0xc   :  { %v77_v27 = vrot.slane %v55_v24, %v46_v21  ;;  %v84_v29 = vrot.slane %v56_v26, %v46_v21  ;;  %v85_v30 = vcombine.high %v63_v25, %v63_v25  ;;  %v86_v35 = vcombine.high %v70_v34, %v70_v34 }
   0xd   :  { %p334_p4 = pnand %p333_p3, %p327_p0 }
   0xe   :  { %169 = vmatprep.mubr.bf16.mxu0 %v77_v27  ;;  %v87_v31 = vcombine.high %v77_v27, %v77_v27  ;;  %v88_v33 = vcombine.high %v84_v29, %v84_v29  ;;  %v29_v49 = vld [vmem:[#allocation2] sm:$0x3] }
   0xf   :  { %170 = vmatmul.mubr.bf16.vlgmr.msra.gmra.mxu0 %v63_v25 }
  0x10   :  { %232 = vmatpush1.bf16.xpose.msra.mxu0 %v319_v28  ;;  %209 = vmatprep.mubr.bf16.mxu1 %v87_v31 }
  0x11   :  { %210 = vmatmul.mubr.bf16.vlgmr.msra.gmra.mxu1 %v85_v30  ;;  %249 = vmatprep.mubr.bf16.mxu0 %v84_v29 }
  0x12   :  { %272 = vmatpush1.bf16.xpose.msra.mxu1 %v321_v32  ;;  %289 = vmatprep.mubr.bf16.mxu1 %v88_v33 }
  0x17   :  { %250 = vmatmul.mubr.bf16.vlgmr.msra.gmra.mxu0 %v70_v34 }
  0x19   :  { %290 = vmatmul.mubr.bf16.vlgmr.msra.gmra.mxu1 %v86_v35 }
  0xcf   :  { %v171_v37 = vpop.f32.mrf.mxu0 }
  0xd1   :  { %v173_v38 = vpop.f32.mrf.mxu0  ;;  %v211_v39 = vpop.f32.mrf.mxu1 }
  0xd2   :  { %v212_v44 = vadd.f32 %v211_v39, %v171_v37 }
  0xd3   :  { %v174_v40 = vpop.f32.mrf.mxu0  ;;  %v213_v41 = vpop.f32.mrf.mxu1 }
  0xd5   :  { %v175_v42 = vpop.f32.mrf.mxu0  ;;  %v214_v43 = vpop.f32.mrf.mxu1 }
  0xd7   :  { %v215_v45 = vpop.f32.mrf.mxu1  ;;  %v251_v46 = vpop.f32.mrf.mxu0 }
  0xd8   :  { %v252_v47 = vadd.f32 %v251_v46, %v212_v44 }
  0xd9   :  { %v253_v48 = vpop.f32.mrf.mxu0  ;;  %v291_v50 = vpop.f32.mrf.mxu1 }
  0xda   :  { %v292_v51 = vadd.f32 %v291_v50, %v252_v47 }
  0xdb   :  { %v254_v52 = vpop.f32.mrf.mxu0  ;;  %v293_v53 = vpop.f32.mrf.mxu1 }
  0xdc   :  { %v297_v54 = vadd.f32 %v292_v51, %v29_v49 }
  0xdd   :  { %v255_v55 = vpop.f32.mrf.mxu0  ;;  %v294_v56 = vpop.f32.mrf.mxu1 }
  0xde   :  { %299 = vst.msk [vmem:[#allocation2] sm:$0x3] %vm27_vm0, %v297_v54 }
  0xdf   :  { %v295_v57 = vpop.f32.mrf.mxu1 }
  0xe0   :  { %337 = shalt.err (!%p334_p4)
}
  0xe1   :  { %309 = dma.vmem_to_hbm [thread:$0]  %s307_s4, 32, %s408_s3, [#allocation3]  }
  0xe2   :  { %346 = dma.done.wait [#allocation3], 32  }
  0xe3   :  { %347 = vsyncadd [#allocation3], 4294967264 }
  0xe4   :  { %313 = vsyncpa [#allocation3], 1 }

</bundles_post_ra>
